<compile_context>
chip_gen: v5e
topology: v5e:2x2
jax: 0.10.0
libtpu: 0.0.40
codegen_flags: <defaults>
</compile_context>

<pallas_src>
import functools
from typing import NamedTuple

import jax
import jax.numpy as jnp
from jax.experimental import pallas as pl
from jax.experimental.pallas import tpu as pltpu

_VMEM_LIMIT = 48 * 1024 * 1024           # <= v7x physical 64 MiB, > default cap
_PRESUP_RESIDENT_LIMIT = 12 * 1024 * 1024  # keep headroom for double buffering


def _round_up(v, m):
    return -(-v // m) * m


def _choose_tile(n, candidates=(512, 384, 256, 128)):
    """Pick the tile first, then pad n up to a multiple of it (review item 2).

    Prefers the largest tile whose padding overhead is <= 50% of the problem.
    """
    n128 = _round_up(n, 128)
    for c in candidates:
        if c > n128:
            continue
        padded = _round_up(n128, c)
        if padded == n128 or (padded - n128) * 2 <= n128:
            return c, padded
    return 128, n128


class PreparedSupports(NamedTuple):
    a_pad: jax.Array   # (S, n_pad, n_pad), zero padded, compute dtype
    num_nodes: int
    tile: int


def prepare_supports(supports, *, compute_dtype=jnp.bfloat16):
    """Stack / pad / cast the adjacency supports once; reuse across layers."""
    a = jnp.stack([jnp.asarray(s, jnp.float32) for s in supports], axis=0)
    s, n, n2 = a.shape
    assert n == n2, "support matrices must be square"
    tile, n_pad = _choose_tile(n)
    a_pad = jnp.pad(a, ((0, 0), (0, n_pad - n), (0, n_pad - n))).astype(
        compute_dtype
    )
    return PreparedSupports(a_pad, n, tile)


# --------------------------------------------------------------------------
# Stage 1: pre_sup[s] = x @ W_s, fused over supports as x @ [W_0 | W_1 | ...]
# --------------------------------------------------------------------------
def _presup_kernel(x_ref, w_ref, o_ref, acc_ref, *, num_support, f_out_pad):
    k = pl.program_id(1)

    @pl.when(k == 0)
    def _():
        acc_ref[...] = jnp.zeros_like(acc_ref)

    acc_ref[...] += jnp.dot(
        x_ref[...], w_ref[...], preferred_element_type=jnp.float32
    )

    @pl.when(k == pl.num_programs(1) - 1)
    def _():
        acc = acc_ref[...]
        for s in range(num_support):   # static unroll, 128-aligned lane slices
            o_ref[s] = acc[:, s * f_out_pad:(s + 1) * f_out_pad].astype(
                o_ref.dtype
            )


def _compute_presup(x_pad, w_cat_pad, num_support, f_out_pad, tm, tkf,
                    out_dtype):
    n_pad, f_in_pad = x_pad.shape
    s_fout = w_cat_pad.shape[1]
    grid = (n_pad // tm, f_in_pad // tkf)
    kernel = functools.partial(
        _presup_kernel, num_support=num_support, f_out_pad=f_out_pad
    )
    out_isize = jnp.dtype(out_dtype).itemsize
    return pl.pallas_call(
        kernel,
        out_shape=jax.ShapeDtypeStruct((num_support, n_pad, f_out_pad),
                                       out_dtype),
        grid_spec=pltpu.PrefetchScalarGridSpec(
            num_scalar_prefetch=0,
            grid=grid,
            in_specs=[
                pl.BlockSpec((tm, tkf), lambda i, k: (i, k)),
                pl.BlockSpec((tkf, s_fout), lambda i, k: (k, 0)),
            ],
            out_specs=pl.BlockSpec(
                (num_support, tm, f_out_pad), lambda i, k: (0, i, 0)
            ),
            scratch_shapes=[pltpu.VMEM((tm, s_fout), jnp.float32)],
        ),
        compiler_params=pltpu.CompilerParams(
            dimension_semantics=("parallel", "arbitrary"),
            vmem_limit_bytes=_VMEM_LIMIT,
        ),
        cost_estimate=pl.CostEstimate(
            flops=2 * n_pad * f_in_pad * s_fout,
            transcendentals=0,
            bytes_accessed=(
                n_pad * f_in_pad * x_pad.dtype.itemsize
                + (n_pad // tm) * f_in_pad * s_fout * w_cat_pad.dtype.itemsize
                + num_support * n_pad * f_out_pad * out_isize
            ),
        ),
    )(x_pad, w_cat_pad)


# --------------------------------------------------------------------------
# Stage 2: out = act( sum_s  A_s @ pre_sup[s] )
# --------------------------------------------------------------------------
def _aggregate_resident_kernel(a_ref, p_ref, o_ref, *, n_pad, tk, apply_relu):
    si = pl.program_id(1)
    k = pl.program_id(2)

    @pl.when((si == 0) & (k == 0))
    def _():
        o_ref[...] = jnp.zeros_like(o_ref)

    # pre_sup slab is VMEM-resident (constant index_map); slice rows here.
    row = pl.multiple_of(si * n_pad + k * tk, tk)
    p_tile = p_ref[pl.ds(row, tk), :]
    o_ref[...] += jnp.dot(a_ref[...], p_tile,
                          preferred_element_type=jnp.float32)

    if apply_relu:

        @pl.when((si == pl.num_programs(1) - 1)
                 & (k == pl.num_programs(2) - 1))
        def _():
            o_ref[...] = jnp.maximum(o_ref[...], 0.0)


def _aggregate_streamed_kernel(a_ref, p_ref, o_ref, *, apply_relu):
    si = pl.program_id(1)
    k = pl.program_id(2)

    @pl.when((si == 0) & (k == 0))
    def _():
        o_ref[...] = jnp.zeros_like(o_ref)

    o_ref[...] += jnp.dot(a_ref[...], p_ref[...],
                          preferred_element_type=jnp.float32)

    if apply_relu:

        @pl.when((si == pl.num_programs(1) - 1)
                 & (k == pl.num_programs(2) - 1))
        def _():
            o_ref[...] = jnp.maximum(o_ref[...], 0.0)


def _aggregate(a_pad, presup2d, n_pad, tm, tk, apply_relu):
    num_support = a_pad.shape[0]
    f_out_pad = presup2d.shape[-1]
    grid = (n_pad // tm, num_support, n_pad // tk)

    presup_bytes = presup2d.size * jnp.dtype(presup2d.dtype).itemsize
    if presup_bytes <= _PRESUP_RESIDENT_LIMIT:
        # pre_sup fully VMEM-resident across the whole grid (fetched once).
        kernel = functools.partial(
            _aggregate_resident_kernel, n_pad=n_pad, tk=tk,
            apply_relu=apply_relu,
        )
        p_spec = pl.BlockSpec(
            (num_support * n_pad, f_out_pad), lambda i, si, k: (0, 0)
        )
    else:
        # Fallback for huge graphs: stream pre_sup tiles per (support, k).
        kernel = functools.partial(
            _aggregate_streamed_kernel, apply_relu=apply_relu
        )
        k_per_sup = n_pad // tk
        p_spec = pl.BlockSpec(
            (tk, f_out_pad), lambda i, si, k: (si * k_per_sup + k, 0)
        )

    return pl.pallas_call(
        kernel,
        out_shape=jax.ShapeDtypeStruct((n_pad, f_out_pad), jnp.float32),
        grid_spec=pltpu.PrefetchScalarGridSpec(
            num_scalar_prefetch=0,
            grid=grid,
            in_specs=[
                pl.BlockSpec((pl.Squeezed(), tm, tk),
                             lambda i, si, k: (si, i, k)),
                p_spec,
            ],
            # same output block across (S, K) -> VMEM-resident accumulator
            out_specs=pl.BlockSpec((tm, f_out_pad), lambda i, si, k: (i, 0)),
        ),
        compiler_params=pltpu.CompilerParams(
            dimension_semantics=("parallel", "arbitrary", "arbitrary"),
            vmem_limit_bytes=_VMEM_LIMIT,
        ),
        cost_estimate=pl.CostEstimate(
            flops=2 * num_support * n_pad * n_pad * f_out_pad,
            transcendentals=0,
            bytes_accessed=(
                num_support * n_pad * n_pad
                * jnp.dtype(a_pad.dtype).itemsize
                + num_support * n_pad * f_out_pad
                * jnp.dtype(presup2d.dtype).itemsize
                + n_pad * f_out_pad * 4
            ),
        ),
    )(a_pad, presup2d)


# --------------------------------------------------------------------------
# Wrapper
# --------------------------------------------------------------------------
def graph_convolution(
    x,
    supports,
    weights,
    *,
    act_relu=True,
    featureless=False,
    compute_dtype=jnp.bfloat16,
    prepared=None,
):
    """Pallas GCN layer forward.

    x        : (N, F_in) node features (ignored if featureless=True)
    supports : list of (N, N) adjacency matrices (may be None if `prepared`)
    weights  : list of (F_in, F_out) weight matrices, one per support
    prepared : optional PreparedSupports; hoists the pad + cast of the
               supports out of the per-layer call so it can be reused.
    """
    if prepared is None:
        prepared = prepare_supports(supports, compute_dtype=compute_dtype)
    a_pad, n, tm = prepared
    compute_dtype = a_pad.dtype        # keep both matmul operands consistent
    n_pad = a_pad.shape[1]
    tk = tm
    num_support = a_pad.shape[0]

    w = jnp.stack([jnp.asarray(wi, jnp.float32) for wi in weights], axis=0)
    assert w.shape[0] == num_support, "one weight matrix per support"
    f_in, f_out = w.shape[1], w.shape[2]
    f_out_pad = _round_up(f_out, 128)

    # TODO(synk): training-time dropout (rate > 0) not implemented; the module
    # default nn.Dropout(0.0) is the identity. The reference forward never
    # adds the bias term, so no bias is applied here either.

    if featureless:
        assert f_in == n, "featureless=True requires input_dim == num_nodes"
        presup = jnp.pad(
            w, ((0, 0), (0, n_pad - n), (0, f_out_pad - f_out))
        ).astype(compute_dtype)
    else:
        assert x.shape == (n, f_in)
        tkf, f_in_pad = _choose_tile(f_in)
        x_pad = jnp.pad(
            jnp.asarray(x, jnp.float32),
            ((0, n_pad - n), (0, f_in_pad - f_in)),
        ).astype(compute_dtype)
        # Fuse per-support weights along the lane axis: x is streamed once and
        # the MXU N-dim becomes num_support * f_out_pad (>= 256 for S >= 2).
        w_pad = jnp.pad(
            w, ((0, 0), (0, f_in_pad - f_in), (0, f_out_pad - f_out))
        )
        w_cat = (
            jnp.transpose(w_pad, (1, 0, 2))
            .reshape(f_in_pad, num_support * f_out_pad)
            .astype(compute_dtype)
        )
        presup = _compute_presup(
            x_pad, w_cat, num_support, f_out_pad, tm, tkf, compute_dtype
        )

    # (S, n_pad, f_out_pad) -> (S*n_pad, f_out_pad): contiguous, free reshape.
    presup2d = presup.reshape(num_support * n_pad, f_out_pad)
    out_pad = _aggregate(a_pad, presup2d, n_pad, tm, tk, act_relu)
    return out_pad[:n, :f_out]


# --------------------------------------------------------------------------
# Reference + test
# --------------------------------------------------------------------------
def _reference(x, supports, weights, act_relu, featureless=False):
    out = None
    for a, w in zip(supports, weights):
        pre = w if featureless else jnp.matmul(x, w, precision="highest")
        term = jnp.matmul(a, pre, precision="highest")
        out = term if out is None else out + term
    if act_relu:
        out = jnp.maximum(out, 0.0)
    return out


if __name__ == "__main__":
    def make_problem(key, n, f_in, f_out, num_support):
        kx, ka, kw = jax.random.split(key, 3)
        x = jax.random.normal(kx, (n, f_in), dtype=jnp.float32)
        supports = []
        for ki in jax.random.split(ka, num_support):
            raw = (jax.random.uniform(ki, (n, n)) > 0.8).astype(jnp.float32)
            adj = raw + jnp.eye(n, dtype=jnp.float32)
            deg = jnp.sum(adj, axis=1, keepdims=True)
            supports.append(adj / deg)
        weights = [
            jax.random.normal(ki, (f_in, f_out), dtype=jnp.float32)
            for ki in jax.random.split(kw, num_support)
        ]
        return x, supports, weights

    key = jax.random.PRNGKey(0)
    k_small, k_med, k_fl = jax.random.split(key, 3)

    # --- 1) Small problem, f32 compute; prepared supports reused twice. ----
    N, F_IN, F_OUT, S = 64, 32, 32, 2
    x, supports, weights = make_problem(k_small, N, F_IN, F_OUT, S)
    prepared_f32 = prepare_supports(supports, compute_dtype=jnp.float32)

    ref_relu = _reference(x, supports, weights, act_relu=True)
    out_relu = graph_convolution(
        x, None, weights, act_relu=True, prepared=prepared_f32,
        compute_dtype=jnp.float32,
    )
    out_relu = jax.block_until_ready(out_relu)
    assert out_relu.shape == (N, F_OUT)
    assert jnp.allclose(out_relu, ref_relu, atol=1e-3, rtol=1e-3), \
        "f32 relu mismatch"

    # Reuse the already padded/cast supports (amortized prep, review item 4).
    ref_lin = _reference(x, supports, weights, act_relu=False)
    out_lin = graph_convolution(
        x, None, weights, act_relu=False, prepared=prepared_f32,
        compute_dtype=jnp.float32,
    )
    out_lin = jax.block_until_ready(out_lin)
    assert jnp.allclose(out_lin, ref_lin, atol=1e-3, rtol=1e-3), \
        "f32 linear mismatch"

    # --- 2) Default bf16-operand path (f32 accumulation). ------------------
    out_bf16 = graph_convolution(x, supports, weights, act_relu=True)
    out_bf16 = jax.block_until_ready(out_bf16)
    assert jnp.allclose(out_bf16, ref_relu, atol=5e-2, rtol=5e-2), \
        "bf16 mismatch"

    # --- 3) Featureless path: out = relu(sum_i A_i @ W_i), W_i: (N, F_out). -
    fl_weights = [
        jax.random.normal(ki, (N, F_OUT), dtype=jnp.float32)
        for ki in jax.random.split(k_fl, S)
    ]
    ref_fl = _reference(x, supports, fl_weights, act_relu=True,
                        featureless=True)
    out_fl = graph_convolution(
        x, supports, fl_weights, act_relu=True, featureless=True,
        compute_dtype=jnp.float32,
    )
    out_fl = jax.block_until_ready(out_fl)
    assert jnp.allclose(out_fl, ref_fl, atol=1e-3, rtol=1e-3), \
        "featureless mismatch"

    # --- 4) Multi-tile problem (exercises row/K tiling + accumulation). ----
    N2, F_IN2, F_OUT2 = 640, 200, 48
    x2, supports2, weights2 = make_problem(k_med, N2, F_IN2, F_OUT2, S)
    ref2 = _reference(x2, supports2, weights2, act_relu=True)
    out2 = graph_convolution(
        x2, supports2, weights2, act_relu=True, compute_dtype=jnp.float32,
    )
    out2 = jax.block_until_ready(out2)
    assert out2.shape == (N2, F_OUT2)
    assert jnp.allclose(out2, ref2, atol=2e-3, rtol=2e-3), \
        "multi-tile mismatch"

    print("KERNEL_OK")
</pallas_src>

<mosaic_0001>
module attributes {stable_mosaic.version = 11 : i64} {
  func.func @_presup_kernel(%arg0: i32, %arg1: i32, %arg2: memref<128x128xf32, #tpu.memory_space<vmem>>, %arg3: memref<128x256xf32, #tpu.memory_space<vmem>>, %arg4: memref<2x128x128xf32, #tpu.memory_space<vmem>>, %arg5: memref<128x256xf32, #tpu.memory_space<vmem>>) attributes {dimension_semantics = [#tpu.dimension_semantics<parallel>, #tpu.dimension_semantics<arbitrary>], iteration_bounds = array<i64: 1, 1>, scalar_prefetch = 0 : i64, scratch_operands = 1 : i64, tpu.core_type = #tpu.core_type<tc>, window_params = [{transform_indices = @transform_0, window_bounds = array<i64: 128, 128>}, {transform_indices = @transform_1, window_bounds = array<i64: 128, 256>}, {transform_indices = @transform_2, window_bounds = array<i64: 2, 128, 128>}]} {
    %c0_i32 = arith.constant 0 : i32
    %0 = arith.cmpi eq, %arg1, %c0_i32 : i32
    %1 = arith.extui %0 : i1 to i32
    %c0_i32_0 = arith.constant 0 : i32
    %2 = arith.cmpi ne, %1, %c0_i32_0 : i32
    scf.if %2 {
      %cst_10 = arith.constant 0.000000e+00 : f32
      %12 = vector.broadcast %cst_10 : f32 to vector<128x256xf32>
      %c0_11 = arith.constant 0 : index
      %c0_12 = arith.constant 0 : index
      %13 = vector.load %arg5[%c0_11, %c0_12] : memref<128x256xf32, #tpu.memory_space<vmem>>, vector<128x256xf32>
      tpu.vector_store %arg5[%c0_11, %c0_12], %12 {strides = array<i32>} : memref<128x256xf32, #tpu.memory_space<vmem>>, vector<128x256xf32>,
    } else {
    }
    %c0 = arith.constant 0 : index
    %c0_1 = arith.constant 0 : index
    %3 = vector.load %arg5[%c0, %c0_1] : memref<128x256xf32, #tpu.memory_space<vmem>>, vector<128x256xf32>
    %c0_2 = arith.constant 0 : index
    %c0_3 = arith.constant 0 : index
    %4 = vector.load %arg2[%c0_2, %c0_3] : memref<128x128xf32, #tpu.memory_space<vmem>>, vector<128x128xf32>
    %c0_4 = arith.constant 0 : index
    %c0_5 = arith.constant 0 : index
    %5 = vector.load %arg3[%c0_4, %c0_5] : memref<128x256xf32, #tpu.memory_space<vmem>>, vector<128x256xf32>
    %cst = arith.constant dense<0.000000e+00> : vector<128x256xf32>
    %6 = tpu.matmul %4, %5, %cst {dimension_numbers = #tpu.dot_dimension_numbers<[1], [0], [0], [1], [0, 0, 1, 1], [], []>} : vector<128x128xf32>, vector<128x256xf32>, vector<128x256xf32> -> vector<128x256xf32>
    %7 = arith.addf %3, %6 : vector<128x256xf32>
    %c0_6 = arith.constant 0 : index
    %c0_7 = arith.constant 0 : index
    %8 = vector.load %arg5[%c0_6, %c0_7] : memref<128x256xf32, #tpu.memory_space<vmem>>, vector<128x256xf32>
    tpu.vector_store %arg5[%c0_6, %c0_7], %7 {strides = array<i32>} : memref<128x256xf32, #tpu.memory_space<vmem>>, vector<128x256xf32>,
    %c0_i32_8 = arith.constant 0 : i32
    %9 = arith.cmpi eq, %arg1, %c0_i32_8 : i32
    %10 = arith.extui %9 : i1 to i32
    %c0_i32_9 = arith.constant 0 : i32
    %11 = arith.cmpi ne, %10, %c0_i32_9 : i32
    scf.if %11 {
      %c0_10 = arith.constant 0 : index
      %c0_11 = arith.constant 0 : index
      %12 = vector.load %arg5[%c0_10, %c0_11] : memref<128x256xf32, #tpu.memory_space<vmem>>, vector<128x256xf32>
      %13 = vector.extract_strided_slice %12 {offsets = [0, 0], sizes = [128, 128], strides = [1, 1]} : vector<128x256xf32> to vector<128x128xf32>
      %c0_12 = arith.constant 0 : index
      %c0_13 = arith.constant 0 : index
      %c0_14 = arith.constant 0 : index
      %14 = vector.load %arg4[%c0_12, %c0_13, %c0_14] : memref<2x128x128xf32, #tpu.memory_space<vmem>>, vector<1x128x128xf32>
      %15 = vector.shape_cast %14 : vector<1x128x128xf32> to vector<128x128xf32>
      %16 = vector.shape_cast %13 : vector<128x128xf32> to vector<1x128x128xf32>
      tpu.vector_store %arg4[%c0_12, %c0_13, %c0_14], %16 {strides = array<i32>} : memref<2x128x128xf32, #tpu.memory_space<vmem>>, vector<1x128x128xf32>,
      %17 = vector.extract_strided_slice %12 {offsets = [0, 128], sizes = [128, 128], strides = [1, 1]} : vector<128x256xf32> to vector<128x128xf32>
      %c1 = arith.constant 1 : index
      %c0_15 = arith.constant 0 : index
      %c0_16 = arith.constant 0 : index
      %18 = vector.load %arg4[%c1, %c0_15, %c0_16] : memref<2x128x128xf32, #tpu.memory_space<vmem>>, vector<1x128x128xf32>
      %19 = vector.shape_cast %18 : vector<1x128x128xf32> to vector<128x128xf32>
      %20 = vector.shape_cast %17 : vector<128x128xf32> to vector<1x128x128xf32>
      tpu.vector_store %arg4[%c1, %c0_15, %c0_16], %20 {strides = array<i32>} : memref<2x128x128xf32, #tpu.memory_space<vmem>>, vector<1x128x128xf32>,
    } else {
    }
    return
  }
  func.func @transform_0(%arg0: i32, %arg1: i32) -> (i32, i32) {
    %c0_i32 = arith.constant 0 : i32
    return %arg0, %arg1 : i32, i32
  }
  func.func @transform_1(%arg0: i32, %arg1: i32) -> (i32, i32) {
    %c0_i32 = arith.constant 0 : i32
    %c0_i32_0 = arith.constant 0 : i32
    return %arg1, %c0_i32 : i32, i32
  }
  func.func @transform_2(%arg0: i32, %arg1: i32) -> (i32, i32, i32) {
    %c0_i32 = arith.constant 0 : i32
    %c0_i32_0 = arith.constant 0 : i32
    %c0_i32_1 = arith.constant 0 : i32
    return %c0_i32, %arg0, %c0_i32_0 : i32, i32, i32
  }
}

</mosaic_0001>

<bundles_post_ra>
// kernel: tpu_custom_call.1
= control target key start
LH: loop header
LB: loop body
LE: loop exit
PB: predicated region body
PF: predicated region fallthrough
CT: control target
= control target key end

     0   :  { %7 = vsyncpa [#allocation4], 0  ;;  %s596_s0 = inlined_call_operand.hbm [shape: f32[128,128], index: 0, kind: input, shape index: {}]   ;;  %s597_s1 = inlined_call_operand.hbm [shape: f32[128,256], index: 1, kind: input, shape index: {}]   ;;  %s598_s2 = inlined_call_operand.hbm [shape: f32[2,128,128], index: 2, kind: output, shape index: {}]  }
   0x1   :  { %8 = vsyncpa [#allocation7], 0 }
   0x2   :  { %9 = vsyncpa [#allocation5], 0  ;;  %s14_s11 = sshll.u32 %s596_s0, 4  ;;  %s559_s12 = smov [#allocation3]   ;;  %s15_s11 = int_to_ptr.hbm [resolvable:$true] %s14_s11 }
   0x3   :  { %s16_s13 = sshll.u32 %s559_s12, 4  ;;  %s27_s16 = sshll.u32 %s597_s1, 4  ;;  %s17_s13 = int_to_ptr.vmem [resolvable:$true] %s16_s13  ;;  %s28_s16 = int_to_ptr.hbm [resolvable:$true] %s27_s16 }
   0x4   :  { %s560_s17 = smov 128   ;;  %s561_s18 = smov 8  }
   0x5   :  { %22 = dma.hbm_to_vmem [thread:$0]  %s15_s11, 2048, %s17_s13, [#allocation4], %s560_s17, %s560_s17, %s561_s18  }
   0x6   :  { %s562_s19 = smov [#allocation6]   ;;  %s563_s21 = smov 256  }
   0x7   :  { %s29_s20 = sshll.u32 %s562_s19, 4  ;;  %s564_s0 = smov 16   ;;  %s30_s20 = int_to_ptr.vmem [resolvable:$true] %s29_s20 }
   0x8   :  { %35 = dma.hbm_to_vmem [thread:$0]  %s28_s16, 4096, %s30_s20, [#allocation7], %s563_s21, %s563_s21, %s564_s0  }
   0x9   :  { %553 = dma.done.wait [#allocation4], 2048  }
   0xa   :  { %554 = vsyncadd [#allocation4], 4294965248 }
   0xb   :  { %555 = dma.done.wait [#allocation7], 4096  }
   0xc   :  { %556 = vsyncadd [#allocation7], 4294963200  ;;  %v158_v0 = vld [vmem:[#allocation6 + $0xf0] sm:$0xff]  ;;  %v159_v1 = vld [vmem:[#allocation6 + $0xf8] sm:$0xff]  ;;  %s565_s1 = smov [#allocation8]   ;;  %s428_s25 = sshll.u32 %s598_s2, 4  ;;  %s429_s25 = int_to_ptr.hbm [resolvable:$true] %s428_s25 }
   0xd   :  { %v156_v2 = vld [vmem:[#allocation6 + $0xe0] sm:$0xff]  ;;  %442 = vmatpush.msra.mxu2 %v158_v0  ;;  %458 = vmatpush.msra.mxu3 %v159_v1  ;;  %v157_v3 = vld [vmem:[#allocation6 + $0xe8] sm:$0xff]  ;;  %v154_v4 = vld [vmem:[#allocation6 + $0xd0] sm:$0xff]  ;;  %s426_s22 = sshll.u32 %s565_s1, 4  ;;  %s427_s22 = int_to_ptr.vmem [resolvable:$true] %s426_s22 }
   0xe   :  { %v155_v5 = vld [vmem:[#allocation6 + $0xd8] sm:$0xff]  ;;  %160 = vmatpush.msra.mxu0 %v158_v0  ;;  %225 = vmatpush.msra.mxu1 %v159_v1  ;;  %v152_v6 = vld [vmem:[#allocation6 + $0xc0] sm:$0xff]  ;;  %v153_v7 = vld [vmem:[#allocation6 + $0xc8] sm:$0xff] }
   0xf   :  { %443 = vmatpush.msra.mxu2 %v156_v2  ;;  %459 = vmatpush.msra.mxu3 %v157_v3  ;;  %v150_v8 = vld [vmem:[#allocation6 + $0xb0] sm:$0xff]  ;;  %v151_v9 = vld [vmem:[#allocation6 + $0xb8] sm:$0xff]  ;;  %v148_v10 = vld [vmem:[#allocation6 + $0xa0] sm:$0xff] }
  0x10   :  { %161 = vmatpush.msra.mxu0 %v156_v2  ;;  %226 = vmatpush.msra.mxu1 %v157_v3  ;;  %v149_v11 = vld [vmem:[#allocation6 + $0xa8] sm:$0xff]  ;;  %v146_v12 = vld [vmem:[#allocation6 + $0x90] sm:$0xff]  ;;  %v147_v13 = vld [vmem:[#allocation6 + $0x98] sm:$0xff] }
  0x11   :  { %444 = vmatpush.msra.mxu2 %v154_v4  ;;  %460 = vmatpush.msra.mxu3 %v155_v5  ;;  %v144_v14 = vld [vmem:[#allocation6 + $0x80] sm:$0xff]  ;;  %v145_v15 = vld [vmem:[#allocation6 + $0x88] sm:$0xff]  ;;  %v142_v16 = vld [vmem:[#allocation6 + $0x70] sm:$0xff] }
  0x12   :  { %162 = vmatpush.msra.mxu0 %v154_v4  ;;  %227 = vmatpush.msra.mxu1 %v155_v5  ;;  %v143_v17 = vld [vmem:[#allocation6 + $0x78] sm:$0xff]  ;;  %v140_v18 = vld [vmem:[#allocation6 + $0x60] sm:$0xff]  ;;  %v141_v19 = vld [vmem:[#allocation6 + $0x68] sm:$0xff] }
  0x13   :  { %445 = vmatpush.msra.mxu2 %v152_v6  ;;  %461 = vmatpush.msra.mxu3 %v153_v7  ;;  %v138_v20 = vld [vmem:[#allocation6 + $0x50] sm:$0xff]  ;;  %v139_v21 = vld [vmem:[#allocation6 + $0x58] sm:$0xff]  ;;  %v136_v22 = vld [vmem:[#allocation6 + $0x40] sm:$0xff] }
  0x14   :  { %163 = vmatpush.msra.mxu0 %v152_v6  ;;  %228 = vmatpush.msra.mxu1 %v153_v7  ;;  %v137_v23 = vld [vmem:[#allocation6 + $0x48] sm:$0xff]  ;;  %v134_v24 = vld [vmem:[#allocation6 + $0x30] sm:$0xff]  ;;  %v135_v25 = vld [vmem:[#allocation6 + $0x38] sm:$0xff] }
  0x15   :  { %446 = vmatpush.msra.mxu2 %v150_v8  ;;  %462 = vmatpush.msra.mxu3 %v151_v9  ;;  %v132_v26 = vld [vmem:[#allocation6 + $0x20] sm:$0xff]  ;;  %v133_v27 = vld [vmem:[#allocation6 + $0x28] sm:$0xff]  ;;  %v130_v28 = vld [vmem:[#allocation6 + $0x10] sm:$0xff] }
  0x16   :  { %164 = vmatpush.msra.mxu0 %v150_v8  ;;  %229 = vmatpush.msra.mxu1 %v151_v9  ;;  %v131_v29 = vld [vmem:[#allocation6 + $0x18] sm:$0xff]  ;;  %v128_v30 = vld [vmem:[#allocation6] sm:$0xff]  ;;  %v129_v31 = vld [vmem:[#allocation6 + $0x8] sm:$0xff] }
  0x17   :  { %447 = vmatpush.msra.mxu2 %v148_v10  ;;  %463 = vmatpush.msra.mxu3 %v149_v11  ;;  %v120_v32 = vld [vmem:[#allocation3 + $0x40] sm:$0xff]  ;;  %v121_v34 = vld [vmem:[#allocation3 + $0x48] sm:$0xff]  ;;  %v122_v36 = vld [vmem:[#allocation3 + $0x50] sm:$0xff] }
  0x18   :  { %165 = vmatpush.msra.mxu0 %v148_v10  ;;  %230 = vmatpush.msra.mxu1 %v149_v11  ;;  %v112_v33 = vld [vmem:[#allocation3] sm:$0xff]  ;;  %v113_v35 = vld [vmem:[#allocation3 + $0x8] sm:$0xff]  ;;  %v114_v37 = vld [vmem:[#allocation3 + $0x10] sm:$0xff] }
  0x19   :  { %448 = vmatpush.msra.mxu2 %v146_v12  ;;  %464 = vmatpush.msra.mxu3 %v147_v13  ;;  %v123_v38 = vld [vmem:[#allocation3 + $0x58] sm:$0xff]  ;;  %v124_v40 = vld [vmem:[#allocation3 + $0x60] sm:$0xff]  ;;  %v125_v42 = vld [vmem:[#allocation3 + $0x68] sm:$0xff] }
  0x1a   :  { %166 = vmatpush.msra.mxu0 %v146_v12  ;;  %231 = vmatpush.msra.mxu1 %v147_v13  ;;  %v115_v39 = vld [vmem:[#allocation3 + $0x18] sm:$0xff]  ;;  %v116_v41 = vld [vmem:[#allocation3 + $0x20] sm:$0xff]  ;;  %v117_v43 = vld [vmem:[#allocation3 + $0x28] sm:$0xff] }
  0x1b   :  { %449 = vmatpush.msra.mxu2 %v144_v14  ;;  %465 = vmatpush.msra.mxu3 %v145_v15  ;;  %v126_v44 = vld [vmem:[#allocation3 + $0x70] sm:$0xff]  ;;  %v127_v46 = vld [vmem:[#allocation3 + $0x78] sm:$0xff] }
  0x1c   :  { %167 = vmatpush.msra.mxu0 %v144_v14  ;;  %232 = vmatpush.msra.mxu1 %v145_v15  ;;  %v118_v45 = vld [vmem:[#allocation3 + $0x30] sm:$0xff]  ;;  %v119_v47 = vld [vmem:[#allocation3 + $0x38] sm:$0xff] }
  0x1d   :  { %450 = vmatpush.msra.mxu2 %v142_v16  ;;  %466 = vmatpush.msra.mxu3 %v143_v17 }
  0x1e   :  { %168 = vmatpush.msra.mxu0 %v142_v16  ;;  %233 = vmatpush.msra.mxu1 %v143_v17 }
  0x1f   :  { %451 = vmatpush.msra.mxu2 %v140_v18  ;;  %467 = vmatpush.msra.mxu3 %v141_v19 }
  0x20   :  { %169 = vmatpush.msra.mxu0 %v140_v18  ;;  %234 = vmatpush.msra.mxu1 %v141_v19 }
  0x21   :  { %452 = vmatpush.msra.mxu2 %v138_v20  ;;  %468 = vmatpush.msra.mxu3 %v139_v21 }
  0x22   :  { %170 = vmatpush.msra.mxu0 %v138_v20  ;;  %235 = vmatpush.msra.mxu1 %v139_v21 }
  0x23   :  { %453 = vmatpush.msra.mxu2 %v136_v22  ;;  %469 = vmatpush.msra.mxu3 %v137_v23 }
  0x24   :  { %171 = vmatpush.msra.mxu0 %v136_v22  ;;  %236 = vmatpush.msra.mxu1 %v137_v23 }
  0x25   :  { %454 = vmatpush.msra.mxu2 %v134_v24  ;;  %470 = vmatpush.msra.mxu3 %v135_v25 }
  0x26   :  { %172 = vmatpush.msra.mxu0 %v134_v24  ;;  %237 = vmatpush.msra.mxu1 %v135_v25 }
  0x27   :  { %455 = vmatpush.msra.mxu2 %v132_v26  ;;  %471 = vmatpush.msra.mxu3 %v133_v27 }
  0x28   :  { %173 = vmatpush.msra.mxu0 %v132_v26  ;;  %238 = vmatpush.msra.mxu1 %v133_v27 }
  0x29   :  { %456 = vmatpush.msra.mxu2 %v130_v28  ;;  %472 = vmatpush.msra.mxu3 %v131_v29 }
  0x2a   :  { %174 = vmatpush.msra.mxu0 %v130_v28  ;;  %239 = vmatpush.msra.mxu1 %v131_v29 }
  0x2b   :  { %457 = vmatpush.msra.mxu2 %v128_v30  ;;  %473 = vmatpush.msra.mxu3 %v129_v31 }
  0x2c   :  { %200 = vmatmul.f32.vlgmr.msra.gmra.mxu2 %v120_v32  ;;  %265 = vmatmul.f32.vlgmr.msra.gmra.mxu3 %v120_v32 }
  0x2d   :  { %175 = vmatpush.msra.mxu0 %v128_v30  ;;  %240 = vmatpush.msra.mxu1 %v129_v31 }
  0x2e   :  { %176 = vmatmul.f32.vlgmr.msra.gmra.mxu0 %v112_v33  ;;  %241 = vmatmul.f32.vlgmr.msra.gmra.mxu1 %v112_v33 }
  0x34   :  { %203 = vmatmul.f32.gmra.mxu2 %v121_v34  ;;  %268 = vmatmul.f32.gmra.mxu3 %v121_v34 }
  0x36   :  { %179 = vmatmul.f32.gmra.mxu0 %v113_v35  ;;  %244 = vmatmul.f32.gmra.mxu1 %v113_v35 }
  0x3c   :  { %206 = vmatmul.f32.gmra.mxu2 %v122_v36  ;;  %271 = vmatmul.f32.gmra.mxu3 %v122_v36 }
  0x3e   :  { %182 = vmatmul.f32.gmra.mxu0 %v114_v37  ;;  %247 = vmatmul.f32.gmra.mxu1 %v114_v37 }
  0x44   :  { %209 = vmatmul.f32.gmra.mxu2 %v123_v38  ;;  %274 = vmatmul.f32.gmra.mxu3 %v123_v38 }
  0x46   :  { %185 = vmatmul.f32.gmra.mxu0 %v115_v39  ;;  %250 = vmatmul.f32.gmra.mxu1 %v115_v39 }
  0x4c   :  { %212 = vmatmul.f32.gmra.mxu2 %v124_v40  ;;  %277 = vmatmul.f32.gmra.mxu3 %v124_v40 }
  0x4e   :  { %188 = vmatmul.f32.gmra.mxu0 %v116_v41  ;;  %253 = vmatmul.f32.gmra.mxu1 %v116_v41 }
  0x54   :  { %215 = vmatmul.f32.gmra.mxu2 %v125_v42  ;;  %280 = vmatmul.f32.gmra.mxu3 %v125_v42 }
  0x56   :  { %191 = vmatmul.f32.gmra.mxu0 %v117_v43  ;;  %256 = vmatmul.f32.gmra.mxu1 %v117_v43 }
  0x5c   :  { %218 = vmatmul.f32.gmra.mxu2 %v126_v44  ;;  %283 = vmatmul.f32.gmra.mxu3 %v126_v44 }
  0x5e   :  { %194 = vmatmul.f32.gmra.mxu0 %v118_v45  ;;  %259 = vmatmul.f32.gmra.mxu1 %v118_v45 }
  0x64   :  { %221 = vmatmul.f32.gmra.mxu2 %v127_v46  ;;  %286 = vmatmul.f32.gmra.mxu3 %v127_v46 }
  0x66   :  { %197 = vmatmul.f32.gmra.mxu0 %v119_v47  ;;  %262 = vmatmul.f32.gmra.mxu1 %v119_v47 }
  0xab   :  { %v177_v48 = vpop.f32.mrf.mxu0  ;;  %v242_v49 = vpop.f32.mrf.mxu1 }
  0xac   :  { %389 = vst [vmem:[#allocation8] sm:$0xff] %v177_v48 }
  0xad   :  { %406 = vst [vmem:[#allocation8 + $0x80] sm:$0xff] %v242_v49 }
  0xaf   :  { %v201_v50 = vpop.f32.mrf.mxu2  ;;  %v266_v51 = vpop.f32.mrf.mxu3 }
  0xb0   :  { %397 = vst [vmem:[#allocation8 + $0x40] sm:$0xff] %v201_v50 }
  0xb1   :  { %414 = vst [vmem:[#allocation8 + $0xc0] sm:$0xff] %v266_v51 }
  0xb3   :  { %v180_v52 = vpop.f32.mrf.mxu0  ;;  %v245_v53 = vpop.f32.mrf.mxu1 }
  0xb4   :  { %390 = vst [vmem:[#allocation8 + $0x8] sm:$0xff] %v180_v52 }
  0xb5   :  { %407 = vst [vmem:[#allocation8 + $0x88] sm:$0xff] %v245_v53 }
  0xb7   :  { %v204_v54 = vpop.f32.mrf.mxu2  ;;  %v269_v55 = vpop.f32.mrf.mxu3 }
  0xb8   :  { %398 = vst [vmem:[#allocation8 + $0x48] sm:$0xff] %v204_v54 }
  0xb9   :  { %415 = vst [vmem:[#allocation8 + $0xc8] sm:$0xff] %v269_v55 }
  0xbb   :  { %v183_v56 = vpop.f32.mrf.mxu0  ;;  %v248_v57 = vpop.f32.mrf.mxu1 }
  0xbc   :  { %391 = vst [vmem:[#allocation8 + $0x10] sm:$0xff] %v183_v56 }
  0xbd   :  { %408 = vst [vmem:[#allocation8 + $0x90] sm:$0xff] %v248_v57 }
  0xbf   :  { %v207_v58 = vpop.f32.mrf.mxu2  ;;  %v272_v59 = vpop.f32.mrf.mxu3 }
  0xc0   :  { %399 = vst [vmem:[#allocation8 + $0x50] sm:$0xff] %v207_v58 }
  0xc1   :  { %416 = vst [vmem:[#allocation8 + $0xd0] sm:$0xff] %v272_v59 }
  0xc3   :  { %v186_v60 = vpop.f32.mrf.mxu0  ;;  %v251_v61 = vpop.f32.mrf.mxu1 }
  0xc4   :  { %392 = vst [vmem:[#allocation8 + $0x18] sm:$0xff] %v186_v60 }
  0xc5   :  { %409 = vst [vmem:[#allocation8 + $0x98] sm:$0xff] %v251_v61 }
  0xc7   :  { %v210_v62 = vpop.f32.mrf.mxu2  ;;  %v275_v63 = vpop.f32.mrf.mxu3 }
  0xc8   :  { %400 = vst [vmem:[#allocation8 + $0x58] sm:$0xff] %v210_v62 }
  0xc9   :  { %417 = vst [vmem:[#allocation8 + $0xd8] sm:$0xff] %v275_v63 }
  0xcb   :  { %v189_v0 = vpop.f32.mrf.mxu0  ;;  %v254_v1 = vpop.f32.mrf.mxu1 }
  0xcc   :  { %393 = vst [vmem:[#allocation8 + $0x20] sm:$0xff] %v189_v0 }
  0xcd   :  { %410 = vst [vmem:[#allocation8 + $0xa0] sm:$0xff] %v254_v1 }
  0xcf   :  { %v213_v2 = vpop.f32.mrf.mxu2  ;;  %v278_v3 = vpop.f32.mrf.mxu3 }
  0xd0   :  { %401 = vst [vmem:[#allocation8 + $0x60] sm:$0xff] %v213_v2 }
  0xd1   :  { %418 = vst [vmem:[#allocation8 + $0xe0] sm:$0xff] %v278_v3 }
  0xd3   :  { %v192_v4 = vpop.f32.mrf.mxu0  ;;  %v257_v5 = vpop.f32.mrf.mxu1 }
  0xd4   :  { %394 = vst [vmem:[#allocation8 + $0x28] sm:$0xff] %v192_v4 }
  0xd5   :  { %411 = vst [vmem:[#allocation8 + $0xa8] sm:$0xff] %v257_v5 }
  0xd7   :  { %v216_v6 = vpop.f32.mrf.mxu2  ;;  %v281_v7 = vpop.f32.mrf.mxu3 }
  0xd8   :  { %402 = vst [vmem:[#allocation8 + $0x68] sm:$0xff] %v216_v6 }
  0xd9   :  { %419 = vst [vmem:[#allocation8 + $0xe8] sm:$0xff] %v281_v7 }
  0xdb   :  { %v195_v8 = vpop.f32.mrf.mxu0  ;;  %v260_v9 = vpop.f32.mrf.mxu1 }
  0xdc   :  { %395 = vst [vmem:[#allocation8 + $0x30] sm:$0xff] %v195_v8 }
  0xdd   :  { %412 = vst [vmem:[#allocation8 + $0xb0] sm:$0xff] %v260_v9 }
  0xdf   :  { %v219_v10 = vpop.f32.mrf.mxu2  ;;  %v284_v11 = vpop.f32.mrf.mxu3 }
  0xe0   :  { %403 = vst [vmem:[#allocation8 + $0x70] sm:$0xff] %v219_v10 }
  0xe1   :  { %420 = vst [vmem:[#allocation8 + $0xf0] sm:$0xff] %v284_v11 }
  0xe3   :  { %v198_v12 = vpop.f32.mrf.mxu0  ;;  %v263_v13 = vpop.f32.mrf.mxu1 }
  0xe4   :  { %396 = vst [vmem:[#allocation8 + $0x38] sm:$0xff] %v198_v12 }
  0xe5   :  { %413 = vst [vmem:[#allocation8 + $0xb8] sm:$0xff] %v263_v13 }
  0xe7   :  { %v222_v14 = vpop.f32.mrf.mxu2  ;;  %v287_v15 = vpop.f32.mrf.mxu3 }
  0xe8   :  { %404 = vst [vmem:[#allocation8 + $0x78] sm:$0xff] %v222_v14 }
  0xe9   :  { %421 = vst [vmem:[#allocation8 + $0xf8] sm:$0xff] %v287_v15 }
  0xea   :  { %434 = dma.vmem_to_hbm [thread:$0]  %s427_s22, 4096, %s429_s25, [#allocation5], %s560_s17, %s560_s17, %s561_s18  }
  0xeb   :  { %557 = dma.done.wait [#allocation5], 4096  }
  0xec   :  { %558 = vsyncadd [#allocation5], 4294963200 }
  0xed   :  { %439 = vsyncpa [#allocation4], 1 }
  0xee   :  { %440 = vsyncpa [#allocation7], 1 }
  0xef   :  { %441 = vsyncpa [#allocation5], 1 }

</bundles_post_ra>
